<compile_context>
chip_gen: v7x
topology: tpu7x:2x2x1
jax: 0.10.0
libtpu: 0.0.40
codegen_flags: <defaults>
</compile_context>

<pallas_src>
import jax
import jax.numpy as jnp
import numpy as np
from jax.experimental import pallas as pl
from jax.experimental.pallas import tpu as pltpu

_LANE = 128
_MIN_ROWS = 16                      # sublane-tile safe for f32 and bf16
_CHUNK = _MIN_ROWS * _LANE          # minimal padding granularity (2048 elems)
_DEFAULT_BLOCK_ROWS = 1024          # 1024*128*4B = 512 KiB per f32 input buffer


# ----------------------------------------------------------------------------
# kernels
# ----------------------------------------------------------------------------
def _make_elem_kernel(beta, has_weight):
    beta = float(beta)
    half_over_beta = 0.5 / beta
    half_beta = 0.5 * beta

    def _loss(pred_ref, target_ref):
        p = pred_ref[...].astype(jnp.float32)
        t = target_ref[...].astype(jnp.float32)
        d = jnp.abs(p - t)
        return jnp.where(d < beta, half_over_beta * d * d, d - half_beta)

    if has_weight:
        def kernel(pred_ref, target_ref, weight_ref, out_ref):
            loss = _loss(pred_ref, target_ref) * weight_ref[...].astype(jnp.float32)
            out_ref[...] = loss.astype(out_ref.dtype)
    else:
        def kernel(pred_ref, target_ref, out_ref):
            out_ref[...] = _loss(pred_ref, target_ref).astype(out_ref.dtype)
    return kernel


def _make_sum_kernel(beta, has_weight, block_rows, total_rows):
    beta = float(beta)
    half_over_beta = 0.5 / beta
    half_beta = 0.5 * beta
    need_mask = (total_rows % block_rows) != 0   # ragged last grid block

    def _body(pred_ref, target_ref, weight_ref, part_ref):
        p = pred_ref[...].astype(jnp.float32)
        t = target_ref[...].astype(jnp.float32)
        d = jnp.abs(p - t)
        loss = jnp.where(d < beta, half_over_beta * d * d, d - half_beta)
        if weight_ref is not None:
            loss = loss * weight_ref[...].astype(jnp.float32)
        if need_mask:
            i = pl.program_id(0)
            row = jax.lax.broadcasted_iota(jnp.int32, loss.shape, 0)
            loss = jnp.where(i * block_rows + row < total_rows, loss, 0.0)
        # per-block lane sums; stored in row 0 of this block's (8,128) partial tile
        lane_sums = jnp.sum(loss, axis=0, keepdims=True)          # (1, 128)
        out_row = jax.lax.broadcasted_iota(jnp.int32, part_ref.shape, 0)
        part_ref[...] = jnp.where(out_row == 0, lane_sums, 0.0)

    if has_weight:
        def kernel(pred_ref, target_ref, weight_ref, part_ref):
            _body(pred_ref, target_ref, weight_ref, part_ref)
    else:
        def kernel(pred_ref, target_ref, part_ref):
            _body(pred_ref, target_ref, None, part_ref)
    return kernel


# ----------------------------------------------------------------------------
# pallas_call wrappers
# ----------------------------------------------------------------------------
def _run_elementwise(pred2d, target2d, weight2d, beta, block_rows):
    R, L = pred2d.shape
    br = min(block_rows, R)
    grid_n = pl.cdiv(R, br)
    tile = lambda: pl.BlockSpec((br, L), lambda i: (i, 0))

    arrays = [pred2d, target2d]
    in_specs = [tile(), tile()]
    if weight2d is not None:
        arrays.append(weight2d)
        in_specs.append(tile())

    return pl.pallas_call(
        _make_elem_kernel(beta, weight2d is not None),
        out_shape=jax.ShapeDtypeStruct((R, L), pred2d.dtype),
        grid_spec=pltpu.PrefetchScalarGridSpec(
            num_scalar_prefetch=0,
            grid=(grid_n,),
            in_specs=in_specs,
            out_specs=tile(),
        ),
        compiler_params=pltpu.CompilerParams(dimension_semantics=("parallel",)),
    )(*arrays)


def _run_sum(pred2d, target2d, weight2d, beta, block_rows):
    R, L = pred2d.shape
    br = min(block_rows, R)
    grid_n = pl.cdiv(R, br)
    tile = lambda: pl.BlockSpec((br, L), lambda i: (i, 0))

    arrays = [pred2d, target2d]
    in_specs = [tile(), tile()]
    if weight2d is not None:
        arrays.append(weight2d)
        in_specs.append(tile())

    partials = pl.pallas_call(
        _make_sum_kernel(beta, weight2d is not None, br, R),
        out_shape=jax.ShapeDtypeStruct((grid_n * 8, L), jnp.float32),
        grid_spec=pltpu.PrefetchScalarGridSpec(
            num_scalar_prefetch=0,
            grid=(grid_n,),
            in_specs=in_specs,
            out_specs=pl.BlockSpec((8, L), lambda i: (i, 0)),
        ),
        compiler_params=pltpu.CompilerParams(dimension_semantics=("parallel",)),
    )(*arrays)
    return jnp.sum(partials)   # tiny (grid_n*8, 128) final reduce in plain JAX


# ----------------------------------------------------------------------------
# module wrapper
# ----------------------------------------------------------------------------
def _as_float(x):
    x = jnp.asarray(x)
    if x.dtype in (jnp.float32, jnp.bfloat16, jnp.float16):
        return x
    return x.astype(jnp.float32)


def _to_slab(x, numel):
    flat = x.reshape(-1)
    padded = ((numel + _CHUNK - 1) // _CHUNK) * _CHUNK
    pad = padded - numel
    if pad:
        flat = jnp.pad(flat, (0, pad))   # zero pad => zero loss contribution
    return flat.reshape(padded // _LANE, _LANE)


class SmoothL1Loss:
    """JAX/Pallas port of mmdet SmoothL1Loss (forward only)."""

    def __init__(self, beta=1.0, reduction="mean", loss_weight=1.0,
                 block_rows=_DEFAULT_BLOCK_ROWS):
        assert beta > 0
        assert reduction in ("none", "mean", "sum")
        assert block_rows % _MIN_ROWS == 0
        self.beta = float(beta)
        self.reduction = reduction
        self.loss_weight = float(loss_weight)
        self.block_rows = int(block_rows)

    def __call__(self, pred, target, weight=None, avg_factor=None,
                 reduction_override=None):
        assert reduction_override in (None, "none", "mean", "sum")
        reduction = reduction_override if reduction_override else self.reduction

        pred = _as_float(pred)
        target = _as_float(target)
        assert pred.shape == target.shape

        orig_shape = pred.shape
        numel = int(np.prod(orig_shape)) if len(orig_shape) > 0 else 1
        if numel == 0:
            # target.numel() == 0 branch of smooth_l1_loss
            return self.loss_weight * (pred * 0.0)

        pred2d = _to_slab(pred, numel)
        target2d = _to_slab(target, numel)
        weight2d = None
        if weight is not None:
            weight2d = _to_slab(_as_float(weight), numel)

        if reduction == "none":
            loss2d = _run_elementwise(pred2d, target2d, weight2d,
                                      self.beta, self.block_rows)
            loss = loss2d.reshape(-1)[:numel].reshape(orig_shape)
            return self.loss_weight * loss

        loss_sum = _run_sum(pred2d, target2d, weight2d,
                            self.beta, self.block_rows)
        if reduction == "sum":
            return self.loss_weight * loss_sum
        # mean
        denom = jnp.float32(numel) if avg_factor is None else jnp.float32(avg_factor)
        return self.loss_weight * (loss_sum / denom)


# ----------------------------------------------------------------------------
# reference & self-test
# ----------------------------------------------------------------------------
def _reference(pred, target, weight, beta, reduction, loss_weight, avg_factor):
    pred = jnp.asarray(pred, jnp.float32)
    target = jnp.asarray(target, jnp.float32)
    diff = jnp.abs(pred - target)
    loss = jnp.where(diff < beta, 0.5 * diff * diff / beta, diff - 0.5 * beta)
    if weight is not None:
        loss = loss * jnp.asarray(weight, jnp.float32)
    if reduction == "none":
        out = loss
    elif reduction == "sum":
        out = jnp.sum(loss)
    else:
        denom = avg_factor if avg_factor is not None else loss.size
        out = jnp.sum(loss) / denom
    return loss_weight * out


if __name__ == "__main__":
    key = jax.random.PRNGKey(0)
    k1, k2, k3, k4, k5 = jax.random.split(key, 5)

    # --- bbox-regression-like inputs: (num_boxes, 4), with weights ---
    pred = jax.random.normal(k1, (128, 4), jnp.float32)
    target = jax.random.normal(k2, (128, 4), jnp.float32)
    weight = (jax.random.uniform(k3, (128, 4)) > 0.3).astype(jnp.float32)

    module = SmoothL1Loss(beta=1.0, reduction="mean", loss_weight=1.0)

    out_mean = jax.block_until_ready(module(pred, target, weight=weight))
    out_sum = jax.block_until_ready(
        module(pred, target, weight=weight, reduction_override="sum"))
    out_none = jax.block_until_ready(
        module(pred, target, weight=weight, reduction_override="none"))
    out_avgf = jax.block_until_ready(
        module(pred, target, weight=weight, avg_factor=100.0))

    assert np.allclose(np.asarray(out_mean),
                       np.asarray(_reference(pred, target, weight, 1.0, "mean", 1.0, None)),
                       atol=1e-5)
    assert np.allclose(np.asarray(out_sum),
                       np.asarray(_reference(pred, target, weight, 1.0, "sum", 1.0, None)),
                       atol=1e-4)
    assert np.allclose(np.asarray(out_none),
                       np.asarray(_reference(pred, target, weight, 1.0, "none", 1.0, None)),
                       atol=1e-5)
    assert np.allclose(np.asarray(out_avgf),
                       np.asarray(_reference(pred, target, weight, 1.0, "mean", 1.0, 100.0)),
                       atol=1e-5)
    assert out_none.shape == pred.shape

    # --- no-weight + multi-block + ragged-tail path (small block_rows forces grid>1) ---
    module2 = SmoothL1Loss(beta=0.5, reduction="mean", loss_weight=2.0, block_rows=32)
    pred_b = jax.random.normal(k4, (128, 40), jnp.float32)
    target_b = jax.random.normal(k5, (128, 40), jnp.float32)

    out2_mean = jax.block_until_ready(module2(pred_b, target_b))
    out2_sum = jax.block_until_ready(module2(pred_b, target_b, reduction_override="sum"))
    out2_none = jax.block_until_ready(module2(pred_b, target_b, reduction_override="none"))

    assert np.allclose(np.asarray(out2_mean),
                       np.asarray(_reference(pred_b, target_b, None, 0.5, "mean", 2.0, None)),
                       atol=1e-5)
    assert np.allclose(np.asarray(out2_sum),
                       np.asarray(_reference(pred_b, target_b, None, 0.5, "sum", 2.0, None)),
                       atol=1e-3)
    assert np.allclose(np.asarray(out2_none),
                       np.asarray(_reference(pred_b, target_b, None, 0.5, "none", 2.0, None)),
                       atol=1e-5)
    assert out2_none.shape == pred_b.shape

    # --- bf16 inputs stay bf16 through the DMA, f32 math in-kernel ---
    pred_bf = pred.astype(jnp.bfloat16)
    target_bf = target.astype(jnp.bfloat16)
    out_bf = jax.block_until_ready(module(pred_bf, target_bf, weight=weight))
    ref_bf = _reference(pred_bf.astype(jnp.float32), target_bf.astype(jnp.float32),
                        weight, 1.0, "mean", 1.0, None)
    assert np.allclose(np.asarray(out_bf), np.asarray(ref_bf), atol=1e-4)

    print("KERNEL_OK")
</pallas_src>

<mosaic_0001>
module attributes {stable_mosaic.version = 11 : i64} {
  func.func @kernel(%arg0: i32, %arg1: memref<16x128xf32, #tpu.memory_space<vmem>>, %arg2: memref<16x128xf32, #tpu.memory_space<vmem>>, %arg3: memref<16x128xf32, #tpu.memory_space<vmem>>, %arg4: memref<8x128xf32, #tpu.memory_space<vmem>>) attributes {dimension_semantics = [#tpu.dimension_semantics<parallel>], iteration_bounds = array<i64: 1>, scalar_prefetch = 0 : i64, scratch_operands = 0 : i64, tpu.core_type = #tpu.core_type<tc>, window_params = [{transform_indices = @transform_0, window_bounds = array<i64: 16, 128>}, {transform_indices = @transform_1, window_bounds = array<i64: 16, 128>}, {transform_indices = @transform_2, window_bounds = array<i64: 16, 128>}, {transform_indices = @transform_3, window_bounds = array<i64: 8, 128>}]} {
    %c0 = arith.constant 0 : index
    %c0_0 = arith.constant 0 : index
    %0 = vector.load %arg1[%c0, %c0_0] : memref<16x128xf32, #tpu.memory_space<vmem>>, vector<16x128xf32>
    %c0_1 = arith.constant 0 : index
    %c0_2 = arith.constant 0 : index
    %1 = vector.load %arg2[%c0_1, %c0_2] : memref<16x128xf32, #tpu.memory_space<vmem>>, vector<16x128xf32>
    %2 = arith.subf %0, %1 : vector<16x128xf32>
    %3 = math.absf %2 : vector<16x128xf32>
    %cst = arith.constant 1.000000e+00 : f32
    %4 = vector.broadcast %cst : f32 to vector<16x128xf32>
    %5 = arith.cmpf olt, %3, %4 : vector<16x128xf32>
    %cst_3 = arith.constant 5.000000e-01 : f32
    %6 = vector.broadcast %cst_3 : f32 to vector<16x128xf32>
    %7 = arith.mulf %6, %3 : vector<16x128xf32>
    %8 = arith.mulf %7, %3 : vector<16x128xf32>
    %cst_4 = arith.constant 5.000000e-01 : f32
    %9 = vector.broadcast %cst_4 : f32 to vector<16x128xf32>
    %10 = arith.subf %3, %9 : vector<16x128xf32>
    %11 = arith.select %5, %8, %10 : vector<16x128xi1>, vector<16x128xf32>
    %c0_5 = arith.constant 0 : index
    %c0_6 = arith.constant 0 : index
    %12 = vector.load %arg3[%c0_5, %c0_6] : memref<16x128xf32, #tpu.memory_space<vmem>>, vector<16x128xf32>
    %13 = arith.mulf %11, %12 : vector<16x128xf32>
    %cst_7 = arith.constant dense<0.000000e+00> : vector<128xf32>
    %14 = vector.multi_reduction <add>, %13, %cst_7 [0] : vector<16x128xf32> to vector<128xf32>
    %15 = vector.shape_cast %14 : vector<128xf32> to vector<1x128xf32>
    %16 = tpu.iota {dimensions = array<i32: 0>} : vector<8x128xi32>
    %c0_i32 = arith.constant 0 : i32
    %17 = vector.broadcast %c0_i32 : i32 to vector<8x128xi32>
    %18 = arith.cmpi eq, %16, %17 : vector<8x128xi32>
    %cst_8 = arith.constant 0.000000e+00 : f32
    %19 = vector.shape_cast %15 : vector<1x128xf32> to vector<1x128xf32>
    %20 = vector.broadcast %19 : vector<1x128xf32> to vector<8x128xf32>
    %21 = vector.broadcast %cst_8 : f32 to vector<8x128xf32>
    %22 = arith.select %18, %20, %21 : vector<8x128xi1>, vector<8x128xf32>
    %c0_9 = arith.constant 0 : index
    %c0_10 = arith.constant 0 : index
    %23 = vector.load %arg4[%c0_9, %c0_10] : memref<8x128xf32, #tpu.memory_space<vmem>>, vector<8x128xf32>
    tpu.vector_store %arg4[%c0_9, %c0_10], %22 {strides = array<i32>} : memref<8x128xf32, #tpu.memory_space<vmem>>, vector<8x128xf32>,
    return
  }
  func.func @transform_0(%arg0: i32) -> (i32, i32) {
    %c0_i32 = arith.constant 0 : i32
    %c0_i32_0 = arith.constant 0 : i32
    return %arg0, %c0_i32 : i32, i32
  }
  func.func @transform_1(%arg0: i32) -> (i32, i32) {
    %c0_i32 = arith.constant 0 : i32
    %c0_i32_0 = arith.constant 0 : i32
    return %arg0, %c0_i32 : i32, i32
  }
  func.func @transform_2(%arg0: i32) -> (i32, i32) {
    %c0_i32 = arith.constant 0 : i32
    %c0_i32_0 = arith.constant 0 : i32
    return %arg0, %c0_i32 : i32, i32
  }
  func.func @transform_3(%arg0: i32) -> (i32, i32) {
    %c0_i32 = arith.constant 0 : i32
    %c0_i32_0 = arith.constant 0 : i32
    return %arg0, %c0_i32 : i32, i32
  }
}

</mosaic_0001>

<bundles_post_ra>
// kernel: tpu_custom_call.1
= control target key start
LH: loop header
LB: loop body
LE: loop exit
PB: predicated region body
PF: predicated region fallthrough
CT: control target
= control target key end

     0   :  { %8 = vsyncpa [#allocation3], 0  ;;  %s298_s0 = inlined_call_operand.hbm [shape: f32[16,128], index: 0, kind: input, shape index: {}]   ;;  %s299_s1 = inlined_call_operand.hbm [shape: f32[16,128], index: 1, kind: input, shape index: {}]   ;;  %s300_s2 = inlined_call_operand.hbm [shape: f32[16,128], index: 2, kind: input, shape index: {}]   ;;  %s301_s3 = inlined_call_operand.hbm [shape: f32[8,128], index: 3, kind: output, shape index: {}]  }
   0x1   :  { %9 = vsyncpa [#allocation6], 0 }
   0x2   :  { %10 = vsyncpa [#allocation4], 0  ;;  %s208_s12 = smov [#allocation5]   ;;  %s209_s14 = smov [#allocation2]  }
   0x3   :  { %s28_s13 = sshll.u32 %s208_s12, 4  ;;  %s16_s15 = sshll.u32 %s209_s14, 4  ;;  %s29_s13 = int_to_ptr.vmem [resolvable:$true] %s28_s13  ;;  %s234_s15 = int_to_ptr.vmem [resolvable:$true] %s16_s15 }
   0x4   :  { %s114_s18 = scalar_lea.hbm %s299_s1, 256 }
   0x5   :  { %p115_p0 = scmp.ne.s32.totalorder %s299_s1, %s114_s18  ;;  %p118_p1 = scmp.lt.u32.totalorder %s114_s18, %s299_s1 }
   0x7   :  { %p120_p2 = pnand %p118_p1, %p115_p0 }
   0x9   :  { %123 = shalt.err (!%p120_p2)
}
   0xa   :  { %s124_s23 = scalar_lea.vmem %s29_s13, 256  ;;  %p129_p4 = scmp.lt.s32.totalorder %s29_s13, %s29_s13 }
   0xb   :  { %p125_p3 = scmp.ne.s32.totalorder %s29_s13, %s124_s23  ;;  %p130_p5 = scmp.lt.s32.totalorder %s124_s23, %s124_s23 }
   0xd   :  { %p131_p6 = por %p130_p5, %p129_p4 }
   0xf   :  { %p132_p7 = pnand %p131_p6, %p125_p3 }
  0x11   :  { %135 = shalt.err (!%p132_p7)
}
  0x12   :  { %s210_s24 = smov 128   ;;  %s211_s25 = smov 8  }
  0x13   :  { %34 = dma.hbm_to_vmem [thread:$0]  %s299_s1, 256, %s29_s13, [#allocation6], %s210_s24, %s210_s24, %s211_s25  }
  0x14   :  { %s136_s30 = scalar_lea.hbm %s298_s0, 256 }
  0x15   :  { %p137_p8 = scmp.ne.s32.totalorder %s298_s0, %s136_s30  ;;  %p140_p9 = scmp.lt.u32.totalorder %s136_s30, %s298_s0 }
  0x17   :  { %p142_p10 = pnand %p140_p9, %p137_p8 }
  0x19   :  { %145 = shalt.err (!%p142_p10)
}
  0x1a   :  { %s146_s8 = scalar_lea.vmem %s234_s15, 256  ;;  %p151_p12 = scmp.lt.s32.totalorder %s234_s15, %s234_s15 }
  0x1b   :  { %p147_p11 = scmp.ne.s32.totalorder %s234_s15, %s146_s8  ;;  %p152_p13 = scmp.lt.s32.totalorder %s146_s8, %s146_s8 }
  0x1d   :  { %p153_p0 = por %p152_p13, %p151_p12 }
  0x1f   :  { %p154_p1 = pnand %p153_p0, %p147_p11 }
  0x21   :  { %157 = shalt.err (!%p154_p1)
}
  0x22   :  { %22 = dma.hbm_to_vmem [thread:$0]  %s298_s0, 256, %s234_s15, [#allocation3], %s210_s24, %s210_s24, %s211_s25  }
  0x23   :  { %s212_s10 = smov [#allocation7]   ;;  %s158_s14 = scalar_lea.hbm %s300_s2, 256 }
  0x24   :  { %s40_s11 = sshll.u32 %s212_s10, 4  ;;  %p159_p2 = scmp.ne.s32.totalorder %s300_s2, %s158_s14  ;;  %s41_s11 = int_to_ptr.vmem [resolvable:$true] %s40_s11 }
  0x25   :  { %p162_p3 = scmp.lt.u32.totalorder %s158_s14, %s300_s2 }
  0x27   :  { %p164_p4 = pnand %p162_p3, %p159_p2 }
  0x29   :  { %167 = shalt.err (!%p164_p4)
}
  0x2a   :  { %s168_s20 = scalar_lea.vmem %s41_s11, 256  ;;  %p173_p6 = scmp.lt.s32.totalorder %s41_s11, %s41_s11 }
  0x2b   :  { %p169_p5 = scmp.ne.s32.totalorder %s41_s11, %s168_s20  ;;  %p174_p7 = scmp.lt.s32.totalorder %s168_s20, %s168_s20 }
  0x2d   :  { %p175_p8 = por %p174_p7, %p173_p6 }
  0x2f   :  { %p176_p9 = pnand %p175_p8, %p169_p5 }
  0x31   :  { %179 = shalt.err (!%p176_p9)
}
  0x32   :  { %46 = dma.hbm_to_vmem [thread:$0]  %s300_s2, 256, %s41_s11, [#allocation6], %s210_s24, %s210_s24, %s211_s25  }
  0x33   :  { %202 = dma.done.wait [#allocation3], 256  }
  0x34   :  { %203 = vsyncadd [#allocation3], 4294967040 }
  0x35   :  { %204 = dma.done.wait [#allocation6], 512  }
  0x36   :  { %205 = vsyncadd [#allocation6], 4294966784  ;;  %v56_v0 = vld [vmem:[#allocation2] sm:$0xff]  ;;  %v57_v1 = vld [vmem:[#allocation2 + $0x8] sm:$0xff]  ;;  %v85_v22 = vlaneseq  ;;  %s213_s2 = smov [#allocation8]  }
  0x37   :  { %v58_v2 = vld [vmem:[#allocation5] sm:$0xff]  ;;  %v59_v3 = vld [vmem:[#allocation5 + $0x8] sm:$0xff]  ;;  %v74_v13 = vld [vmem:[#allocation7] sm:$0xff]  ;;  %s96_s21 = sshll.u32 %s213_s2, 4  ;;  %s97_s21 = int_to_ptr.vmem [resolvable:$true] %s96_s21 }
  0x38   :  { %v60_v4 = vsub.f32 %v56_v0, %v58_v2  ;;  %v61_v5 = vsub.f32 %v57_v1, %v59_v3  ;;  %v75_v15 = vld [vmem:[#allocation7 + $0x8] sm:$0xff]  ;;  %v86_v25 = vshrl.u32 %v85_v22, 7  ;;  %s180_s22 = scalar_lea.vmem %s97_s21, 128  ;;  %p185_p11 = scmp.lt.s32.totalorder %s97_s21, %s97_s21 }
  0x39   :  { %p181_p10 = scmp.ne.s32.totalorder %s97_s21, %s180_s22  ;;  %p186_p12 = scmp.lt.s32.totalorder %s180_s22, %s180_s22 }
  0x3a   :  { %v62_v6 = vand.u32 2147483647, %v60_v4  ;;  %v63_v7 = vand.u32 2147483647, %v61_v5  ;;  %vm87_vm2 = vcmp.eq.s32.totalorder %v86_v25, 0 }
  0x3b   :  { %p187_p13 = por %p186_p12, %p185_p11 }
  0x3c   :  { %v66_v8 = vmul.f32 0.5, %v62_v6  ;;  %v106_v9 = vadd.f32 -0.5, %v62_v6  ;;  %vm64_vm0 = vcmp.lt.f32.partialorder %v62_v6, 1.0  ;;  %v67_v10 = vmul.f32 0.5, %v63_v7 }
  0x3d   :  { %v107_v11 = vadd.f32 -0.5, %v63_v7  ;;  %vm65_vm1 = vcmp.lt.f32.partialorder %v63_v7, 1.0  ;;  %p188_p0 = pnand %p187_p13, %p181_p10 }
  0x3e   :  { %v68_v12 = vmul.f32 %v66_v8, %v62_v6  ;;  %v69_v14 = vmul.f32 %v67_v10, %v63_v7 }
  0x40   :  { %v72_v16 = vsel %vm64_vm0, %v68_v12, %v106_v9  ;;  %v73_v17 = vsel %vm65_vm1, %v69_v14, %v107_v11 }
  0x41   :  { %v76_v18 = vmul.f32 %v74_v13, %v72_v16  ;;  %v77_v19 = vmul.f32 %v75_v15, %v73_v17 }
  0x43   :  { %v78_v20 = vadd.f32 %v77_v19, %v76_v18 }
  0x45   :  { %v79_v21 = vrot.slane %v78_v20, 4 }
  0x47   :  { %v80_v23 = vadd.f32 %v79_v21, %v78_v20 }
  0x49   :  { %v81_v24 = vrot.slane %v80_v23, 2 }
  0x4b   :  { %v82_v26 = vadd.f32 %v81_v24, %v80_v23 }
  0x4d   :  { %v83_v27 = vrot.slane %v82_v26, 1 }
  0x4f   :  { %v84_v28 = vadd.f32 %v83_v27, %v82_v26 }
  0x51   :  { %v88_v29 = vsel %vm87_vm2, %v84_v28, 0.0 }
  0x52   :  { %89 = vst [vmem:[#allocation8] sm:$0xff] %v88_v29 }
  0x53   :  { %191 = shalt.err (!%p188_p0)
}
  0x54   :  { %s192_s25 = scalar_lea.hbm %s301_s3, 128 }
  0x55   :  { %p193_p1 = scmp.ne.s32.totalorder %s301_s3, %s192_s25  ;;  %p196_p2 = scmp.lt.u32.totalorder %s192_s25, %s301_s3 }
  0x57   :  { %p198_p3 = pnand %p196_p2, %p193_p1 }
  0x59   :  { %201 = shalt.err (!%p198_p3)
}
  0x5a   :  { %99 = dma.vmem_to_hbm [thread:$0]  %s97_s21, 128, %s301_s3, [#allocation4]  }
  0x5b   :  { %206 = dma.done.wait [#allocation4], 128  }
  0x5c   :  { %207 = vsyncadd [#allocation4], 4294967168 }
  0x5d   :  { %103 = vsyncpa [#allocation3], 1 }
  0x5e   :  { %104 = vsyncpa [#allocation6], 1 }
  0x5f   :  { %105 = vsyncpa [#allocation4], 1 }

</bundles_post_ra>
